<compile_context>
chip_gen: v5e
topology: v5e:2x2
jax: 0.10.0
libtpu: 0.0.40
codegen_flags: <defaults>
</compile_context>

<pallas_src>
import math

import jax
import jax.numpy as jnp
from jax.experimental import pallas as pl
from jax.experimental.pallas import tpu as pltpu


def _make_gaussian_kernel(mu: float, gamma: float):
    """Build a kernel body with mu / gamma folded in as compile-time constants."""
    mu_f = float(mu)
    gamma_f = float(gamma)  # gamma = -0.5 / sigma^2

    def kernel(x_ref, o_ref):
        # Compute in f32 regardless of input dtype; cast only at the store.
        x = x_ref[...].astype(jnp.float32)
        adj = x - mu_f
        o_ref[...] = jnp.exp(adj * adj * gamma_f).astype(o_ref.dtype)

    return kernel


def gaussian_kernel(
    x,
    mu: float = 1.0,
    sigma: float = 1.0,
    *,
    lanes: int = 1024,
    target_tile_bytes: int = 2 << 20,  # ~2 MiB of input per grid step
):
    """exp(-0.5*(x-mu)^2/sigma^2) elementwise via a Pallas TPU kernel.

    mu / sigma are the module's (non-trainable) scalar parameters, i.e. plain
    Python floats, so they are baked into the kernel as constants.
    """
    orig_shape = x.shape
    dtype = x.dtype
    n = math.prod(orig_shape) if orig_shape else 1
    itemsize = jnp.dtype(dtype).itemsize

    # Single precomputed scalar: o = exp((x - mu)^2 * gamma). Same semantics as
    # the reference (including sigma == 0 -> inf/NaN behavior).
    gamma = -0.5 / (float(sigma) * float(sigma))

    # ---- lane-dense 2D layout ------------------------------------------------
    C = max(128, (lanes // 128) * 128)  # columns: large multiple of 128
    # Minimum sublane multiple for this dtype (8 for f32, 16 for bf16, 32 for i8).
    sub = 8 * max(1, 4 // itemsize)

    rows_needed = -(-n // C)                       # cdiv(n, C)
    rows_min_padded = -(-rows_needed // sub) * sub  # round up to packing minimum

    # Rows per block: target ~target_tile_bytes of input, multiple of `sub`,
    # never more than the (padded) total so small inputs stay small.
    br = max(sub, (target_tile_bytes // (C * itemsize)) // sub * sub)
    br = min(br, rows_min_padded)

    padded_rows = -(-rows_min_padded // br) * br
    pad_elems = padded_rows * C - n

    flat = x.reshape(-1)
    if pad_elems:
        flat = jnp.pad(flat, (0, pad_elems))
    x2d = flat.reshape(padded_rows, C)

    grid = (padded_rows // br,)

    # VMEM budget: input + output tiles, double-buffered, plus headroom for
    # f32 intermediates. Stays well under v7x's 64 MiB physical VMEM.
    tile_in = br * C * itemsize
    tile_f32 = br * C * 4
    vmem_limit = min(48 << 20, max(16 << 20, 2 * (tile_in + tile_f32) + tile_f32 + (2 << 20)))

    out = pl.pallas_call(
        _make_gaussian_kernel(mu, gamma),
        out_shape=jax.ShapeDtypeStruct((padded_rows, C), dtype),
        grid_spec=pltpu.PrefetchScalarGridSpec(
            num_scalar_prefetch=0,
            grid=grid,
            in_specs=[pl.BlockSpec((br, C), lambda i: (i, 0))],
            out_specs=pl.BlockSpec((br, C), lambda i: (i, 0)),
        ),
        compiler_params=pltpu.CompilerParams(
            dimension_semantics=("parallel",),  # shards across v7x's 2 TCs
            vmem_limit_bytes=int(vmem_limit),
        ),
    )(x2d)

    out_flat = out.reshape(-1)
    if pad_elems:
        out_flat = out_flat[:n]
    return out_flat.reshape(orig_shape)


def gaussian_kernel_ref(x, mu: float = 1.0, sigma: float = 1.0):
    xf = x.astype(jnp.float32)
    adj = xf - mu
    return jnp.exp(-0.5 * adj * adj / sigma / sigma).astype(x.dtype)


if __name__ == "__main__":
    key = jax.random.PRNGKey(0)
    mu, sigma = 1.0, 1.0  # module __init__ defaults

    # (batch, L_q, L_d) similarity tensor, f32, nicely shaped.
    k1, k2 = jax.random.split(key)
    x1 = jax.random.uniform(k1, (2, 8, 128), dtype=jnp.float32, minval=-1.0, maxval=1.0)
    out1 = jax.block_until_ready(gaussian_kernel(x1, mu=mu, sigma=sigma))
    ref1 = gaussian_kernel_ref(x1, mu=mu, sigma=sigma)
    assert out1.shape == x1.shape and out1.dtype == x1.dtype
    assert jnp.allclose(out1, ref1, atol=1e-6, rtol=1e-6)

    # Ragged shape (L_d not a multiple of 128) -> exercises the padding path.
    x2 = jax.random.uniform(k2, (3, 17, 50), dtype=jnp.float32, minval=-2.0, maxval=2.0)
    out2 = jax.block_until_ready(gaussian_kernel(x2, mu=mu, sigma=sigma))
    ref2 = gaussian_kernel_ref(x2, mu=mu, sigma=sigma)
    assert out2.shape == x2.shape and out2.dtype == x2.dtype
    assert jnp.allclose(out2, ref2, atol=1e-6, rtol=1e-6)

    # bf16 input: f32 internal compute, cast at store.
    x3 = x1.astype(jnp.bfloat16)
    out3 = jax.block_until_ready(gaussian_kernel(x3, mu=mu, sigma=sigma))
    ref3 = gaussian_kernel_ref(x3, mu=mu, sigma=sigma)
    assert out3.shape == x3.shape and out3.dtype == x3.dtype
    assert jnp.allclose(out3.astype(jnp.float32), ref3.astype(jnp.float32), atol=1e-2, rtol=1e-2)

    print("KERNEL_OK")
</pallas_src>

<mosaic_0001>
module attributes {stable_mosaic.version = 11 : i64} {
  func.func @kernel(%arg0: i32, %arg1: memref<8x1024xf32, #tpu.memory_space<vmem>>, %arg2: memref<8x1024xf32, #tpu.memory_space<vmem>>) attributes {dimension_semantics = [#tpu.dimension_semantics<parallel>], iteration_bounds = array<i64: 1>, scalar_prefetch = 0 : i64, scratch_operands = 0 : i64, tpu.core_type = #tpu.core_type<tc>, window_params = [{transform_indices = @transform_0, window_bounds = array<i64: 8, 1024>}, {transform_indices = @transform_1, window_bounds = array<i64: 8, 1024>}]} {
    %c0 = arith.constant 0 : index
    %c0_0 = arith.constant 0 : index
    %0 = vector.load %arg1[%c0, %c0_0] : memref<8x1024xf32, #tpu.memory_space<vmem>>, vector<8x1024xf32>
    %cst = arith.constant 1.000000e+00 : f32
    %1 = vector.broadcast %cst : f32 to vector<8x1024xf32>
    %2 = arith.subf %0, %1 : vector<8x1024xf32>
    %3 = arith.mulf %2, %2 : vector<8x1024xf32>
    %cst_1 = arith.constant -5.000000e-01 : f32
    %4 = vector.broadcast %cst_1 : f32 to vector<8x1024xf32>
    %5 = arith.mulf %3, %4 : vector<8x1024xf32>
    %6 = math.exp %5 : vector<8x1024xf32>
    %c0_2 = arith.constant 0 : index
    %c0_3 = arith.constant 0 : index
    %7 = vector.load %arg2[%c0_2, %c0_3] : memref<8x1024xf32, #tpu.memory_space<vmem>>, vector<8x1024xf32>
    tpu.vector_store %arg2[%c0_2, %c0_3], %6 {strides = array<i32>} : memref<8x1024xf32, #tpu.memory_space<vmem>>, vector<8x1024xf32>,
    return
  }
  func.func @transform_0(%arg0: i32) -> (i32, i32) {
    %c0_i32 = arith.constant 0 : i32
    %c0_i32_0 = arith.constant 0 : i32
    return %arg0, %c0_i32 : i32, i32
  }
  func.func @transform_1(%arg0: i32) -> (i32, i32) {
    %c0_i32 = arith.constant 0 : i32
    %c0_i32_0 = arith.constant 0 : i32
    return %arg0, %c0_i32 : i32, i32
  }
}

</mosaic_0001>

<bundles_post_ra>
// kernel: tpu_custom_call.1
= control target key start
LH: loop header
LB: loop body
LE: loop exit
PB: predicated region body
PF: predicated region fallthrough
CT: control target
= control target key end

     0   :  { %6 = vsyncpa [#allocation3], 0  ;;  %s192_s0 = inlined_call_operand.hbm [shape: f32[8,1024], index: 0, kind: input, shape index: {}]   ;;  %s193_s1 = inlined_call_operand.hbm [shape: f32[8,1024], index: 1, kind: output, shape index: {}]  }
   0x1   :  { %7 = vsyncpa [#allocation4], 0  ;;  %s13_s8 = sshll.u32 %s192_s0, 4  ;;  %s174_s9 = smov [#allocation2]   ;;  %s14_s8 = int_to_ptr.hbm [resolvable:$true] %s13_s8 }
   0x2   :  { %s15_s10 = sshll.u32 %s174_s9, 4  ;;  %s16_s10 = int_to_ptr.vmem [resolvable:$true] %s15_s10 }
   0x3   :  { %18 = dma.hbm_to_vmem [thread:$0]  %s14_s8, 1024, %s16_s10, [#allocation3]  }
   0x4   :  { %170 = dma.done.wait [#allocation3], 1024  }
   0x5   :  { %171 = vsyncadd [#allocation3], 4294966272  ;;  %v23_v0 = vld [vmem:[#allocation2] sm:$0xff]  ;;  %v24_v1 = vld [vmem:[#allocation2 + $0x8] sm:$0xff]  ;;  %s175_s0 = smov [#allocation5]   ;;  %s86_s14 = sshll.u32 %s193_s1, 4  ;;  %s87_s14 = int_to_ptr.hbm [resolvable:$true] %s86_s14 }
   0x6   :  { %v25_v2 = vld [vmem:[#allocation2 + $0x10] sm:$0xff]  ;;  %v96_v3 = vadd.f32 -1.0, %v23_v0  ;;  %v97_v4 = vadd.f32 -1.0, %v24_v1  ;;  %v26_v6 = vld [vmem:[#allocation2 + $0x18] sm:$0xff]  ;;  %v27_v7 = vld [vmem:[#allocation2 + $0x20] sm:$0xff]  ;;  %s84_s11 = sshll.u32 %s175_s0, 4  ;;  %s85_s11 = int_to_ptr.vmem [resolvable:$true] %s84_s11 }
   0x7   :  { %v98_v5 = vadd.f32 -1.0, %v25_v2  ;;  %v28_v8 = vld [vmem:[#allocation2 + $0x28] sm:$0xff]  ;;  %v99_v9 = vadd.f32 -1.0, %v26_v6  ;;  %v100_v10 = vadd.f32 -1.0, %v27_v7  ;;  %v29_v12 = vld [vmem:[#allocation2 + $0x30] sm:$0xff]  ;;  %v30_v13 = vld [vmem:[#allocation2 + $0x38] sm:$0xff] }
   0x8   :  { %v101_v11 = vadd.f32 -1.0, %v28_v8  ;;  %v39_v14 = vmul.f32 %v96_v3, %v96_v3  ;;  %v40_v15 = vmul.f32 %v97_v4, %v97_v4  ;;  %v102_v17 = vadd.f32 -1.0, %v29_v12 }
   0x9   :  { %v41_v16 = vmul.f32 %v98_v5, %v98_v5  ;;  %v42_v18 = vmul.f32 %v99_v9, %v99_v9  ;;  %v43_v19 = vmul.f32 %v100_v10, %v100_v10  ;;  %v103_v21 = vadd.f32 -1.0, %v30_v13 }
   0xa   :  { %v44_v20 = vmul.f32 %v101_v11, %v101_v11  ;;  %v47_v22 = vmul.f32 -0.5, %v39_v14  ;;  %v48_v23 = vmul.f32 -0.5, %v40_v15  ;;  %v45_v25 = vmul.f32 %v102_v17, %v102_v17 }
   0xb   :  { %v49_v24 = vmul.f32 -0.5, %v41_v16  ;;  %v50_v26 = vmul.f32 -0.5, %v42_v18  ;;  %v51_v27 = vmul.f32 -0.5, %v43_v19  ;;  %v46_v29 = vmul.f32 %v103_v21, %v103_v21 }
   0xc   :  { %v52_v28 = vmul.f32 -0.5, %v44_v20  ;;  %v55_v30 = vmul.f32 1.442695, %v47_v22  ;;  %v57_v31 = vmul.f32 1.442695, %v48_v23  ;;  %v53_v35 = vmul.f32 -0.5, %v45_v25 }
   0xd   :  { %v59_v32 = vmul.f32 1.442695, %v49_v24  ;;  %v61_v33 = vmul.f32 1.442695, %v50_v26  ;;  %v63_v34 = vmul.f32 1.442695, %v51_v27 }
   0xe   :  { %106 = vpow2.f32 %v55_v30  ;;  %v54_v36 = vmul.f32 -0.5, %v46_v29  ;;  %v65_v37 = vmul.f32 1.442695, %v52_v28  ;;  %v67_v38 = vmul.f32 1.442695, %v53_v35 }
   0xf   :  { %108 = vpow2.f32 %v57_v31 }
  0x10   :  { %110 = vpow2.f32 %v59_v32  ;;  %v69_v39 = vmul.f32 1.442695, %v54_v36 }
  0x11   :  { %112 = vpow2.f32 %v61_v33 }
  0x12   :  { %114 = vpow2.f32 %v63_v34 }
  0x13   :  { %116 = vpow2.f32 %v65_v37 }
  0x14   :  { %v107_v40 = vpop.eup %106  ;;  %118 = vpow2.f32 %v67_v38 }
  0x15   :  { %v109_v41 = vpop.eup %108  ;;  %71 = vst [vmem:[#allocation5] sm:$0xff] %v107_v40  ;;  %120 = vpow2.f32 %v69_v39 }
  0x16   :  { %v111_v42 = vpop.eup %110  ;;  %72 = vst [vmem:[#allocation5 + $0x8] sm:$0xff] %v109_v41 }
  0x17   :  { %v113_v43 = vpop.eup %112  ;;  %73 = vst [vmem:[#allocation5 + $0x10] sm:$0xff] %v111_v42 }
  0x18   :  { %v115_v44 = vpop.eup %114  ;;  %74 = vst [vmem:[#allocation5 + $0x18] sm:$0xff] %v113_v43 }
  0x19   :  { %v117_v45 = vpop.eup %116  ;;  %75 = vst [vmem:[#allocation5 + $0x20] sm:$0xff] %v115_v44 }
  0x1a   :  { %v119_v46 = vpop.eup %118  ;;  %76 = vst [vmem:[#allocation5 + $0x28] sm:$0xff] %v117_v45 }
  0x1b   :  { %v121_v47 = vpop.eup %120  ;;  %77 = vst [vmem:[#allocation5 + $0x30] sm:$0xff] %v119_v46 }
  0x1c   :  { %78 = vst [vmem:[#allocation5 + $0x38] sm:$0xff] %v121_v47 }
  0x1d   :  { %89 = dma.vmem_to_hbm [thread:$0]  %s85_s11, 1024, %s87_s14, [#allocation4]  }
  0x1e   :  { %172 = dma.done.wait [#allocation4], 1024  }
  0x1f   :  { %173 = vsyncadd [#allocation4], 4294966272 }
  0x20   :  { %94 = vsyncpa [#allocation3], 1 }
  0x21   :  { %95 = vsyncpa [#allocation4], 1 }

</bundles_post_ra>
